<compile_context>
chip_gen: v5e
topology: v5e:2x2
jax: 0.10.0
libtpu: 0.0.40
codegen_flags: <defaults>
</compile_context>

<pallas_src>
import functools

import jax
import jax.numpy as jnp
from jax.experimental import pallas as pl
from jax.experimental.pallas import tpu as pltpu

LANE = 128          # lane-dense last dim
SUB = 8             # sublane multiple
TM_TARGET = 2048    # rows per block -> (2048, 128) f32 tile = 1 MiB


def _ternary_tanh_kernel_beta_ge1(x_ref, o_ref, *, beta):
    # beta >= 1 branch:
    #   y = 0.5*tanh(2*b*x - b) - 0.5*tanh(-2*b*x - b)
    #     = 0.5*(tanh(t - b) + tanh(t + b)),   t = 2*b*x   (tanh is odd)
    x = x_ref[...].astype(jnp.float32)     # in-register upcast (safe on v5e)
    t = x * (2.0 * beta)
    y = 0.5 * (jnp.tanh(t - beta) + jnp.tanh(t + beta))
    o_ref[...] = y.astype(o_ref.dtype)


def _ternary_tanh_kernel_sign(x_ref, o_ref):
    # beta == 0 branch: sign(x)
    o_ref[...] = jnp.sign(x_ref[...]).astype(o_ref.dtype)


def _ternary_tanh_kernel_hard(x_ref, o_ref):
    # beta < 0 branch: hardtanh(x)
    o_ref[...] = jnp.clip(x_ref[...], -1.0, 1.0).astype(o_ref.dtype)


def _ternary_tanh_kernel_threshold(x_ref, o_ref, *, beta):
    # 0 < beta < 1 branch: sign(x) * (|x| > beta)
    x = x_ref[...].astype(jnp.float32)
    y = jnp.sign(x) * (jnp.abs(x) > beta).astype(jnp.float32)
    o_ref[...] = y.astype(o_ref.dtype)


def _select_kernel(beta):
    # NOTE: branch requires a *static* Python float beta (it is a module
    # hyper-parameter in the PyTorch spec, never a traced value).
    if beta >= 1.0:
        return functools.partial(_ternary_tanh_kernel_beta_ge1, beta=float(beta))
    elif beta == 0.0:
        return _ternary_tanh_kernel_sign
    elif beta < 0.0:
        return _ternary_tanh_kernel_hard
    else:
        return functools.partial(_ternary_tanh_kernel_threshold, beta=float(beta))


def _run_2d(x2d, kern, out_dtype):
    rows, _ = x2d.shape
    if rows <= 2 * SUB:
        tm = rows  # single full-dim block (legal regardless of /8 divisibility)
    else:
        # keep >=2 grid steps (v7x megacore) and cap block at ~1 MiB (f32)
        half = max(SUB, (rows // 2) // SUB * SUB)
        tm = min(TM_TARGET, half)
    grid = (pl.cdiv(rows, tm),)
    return pl.pallas_call(
        kern,
        out_shape=jax.ShapeDtypeStruct((rows, LANE), out_dtype),
        grid_spec=pltpu.PrefetchScalarGridSpec(
            num_scalar_prefetch=0,
            grid=grid,
            in_specs=[pl.BlockSpec((tm, LANE), lambda i: (i, 0))],
            out_specs=pl.BlockSpec((tm, LANE), lambda i: (i, 0)),
        ),
        compiler_params=pltpu.CompilerParams(
            dimension_semantics=("parallel",)),
    )(x2d)


def ternary_tanh(x, beta=2.0):
    """TernaryTanh forward. x: any shape (e.g. NCHW). Returns same shape/dtype.

    Input keeps its original dtype end-to-end (no f32 staging in the wrapper).
    When x.size is a multiple of 128 (typical conv activations) there is no
    padding or slicing; otherwise a small pad/slice fallback handles the tail.
    """
    orig_shape = x.shape
    out_dtype = x.dtype
    n = x.size
    kern = _select_kernel(float(beta))

    if n % LANE == 0:
        # No pad / slice: reshape of a contiguous array is layout-only.
        x2d = x.reshape(n // LANE, LANE)
        out2d = _run_2d(x2d, kern, out_dtype)
        return out2d.reshape(orig_shape)
    else:
        rows = pl.cdiv(n, LANE)
        total = rows * LANE
        x_flat = jnp.pad(x.reshape(-1), (0, total - n))
        out2d = _run_2d(x_flat.reshape(rows, LANE), kern, out_dtype)
        return out2d.reshape(-1)[:n].reshape(orig_shape)


def _reference(x, beta=2.0):
    xf = x.astype(jnp.float32)
    if beta >= 1.0:
        y = jnp.tanh(xf * beta * 2.0 - beta) * 0.5
        y = y - jnp.tanh(-xf * beta * 2.0 - beta) * 0.5
    elif beta == 0.0:
        y = jnp.sign(xf)
    elif beta < 0.0:
        y = jnp.clip(xf, -1.0, 1.0)
    else:
        y = jnp.sign(xf) * (jnp.abs(xf) > beta).astype(jnp.float32)
    return y.astype(x.dtype)


if __name__ == "__main__":
    key = jax.random.PRNGKey(0)
    # NCHW input, consistent with typical PyTorch conv activations.
    x = jax.random.normal(key, (2, 4, 16, 16), dtype=jnp.float32) * 2.0

    y = ternary_tanh(x, beta=2.0)
    y = jax.block_until_ready(y)

    y_ref = _reference(x, beta=2.0)
    assert y.shape == x.shape and y.dtype == x.dtype
    assert jnp.allclose(y, y_ref, atol=1e-5, rtol=1e-5), "mismatch vs reference"

    print("KERNEL_OK")
</pallas_src>

<mosaic_0001>
module attributes {stable_mosaic.version = 11 : i64} {
  func.func @_ternary_tanh_kernel_beta_ge1(%arg0: i32, %arg1: memref<16x128xf32, #tpu.memory_space<vmem>>, %arg2: memref<16x128xf32, #tpu.memory_space<vmem>>) attributes {dimension_semantics = [#tpu.dimension_semantics<parallel>], iteration_bounds = array<i64: 1>, scalar_prefetch = 0 : i64, scratch_operands = 0 : i64, tpu.core_type = #tpu.core_type<tc>, window_params = [{transform_indices = @transform_0, window_bounds = array<i64: 16, 128>}, {transform_indices = @transform_1, window_bounds = array<i64: 16, 128>}]} {
    %c0 = arith.constant 0 : index
    %c0_0 = arith.constant 0 : index
    %0 = vector.load %arg1[%c0, %c0_0] : memref<16x128xf32, #tpu.memory_space<vmem>>, vector<16x128xf32>
    %cst = arith.constant 4.000000e+00 : f32
    %1 = vector.broadcast %cst : f32 to vector<16x128xf32>
    %2 = arith.mulf %0, %1 : vector<16x128xf32>
    %cst_1 = arith.constant 2.000000e+00 : f32
    %3 = vector.broadcast %cst_1 : f32 to vector<16x128xf32>
    %4 = arith.subf %2, %3 : vector<16x128xf32>
    %5 = math.tanh %4 : vector<16x128xf32>
    %cst_2 = arith.constant 2.000000e+00 : f32
    %6 = vector.broadcast %cst_2 : f32 to vector<16x128xf32>
    %7 = arith.addf %2, %6 : vector<16x128xf32>
    %8 = math.tanh %7 : vector<16x128xf32>
    %9 = arith.addf %5, %8 : vector<16x128xf32>
    %cst_3 = arith.constant 5.000000e-01 : f32
    %10 = vector.broadcast %cst_3 : f32 to vector<16x128xf32>
    %11 = arith.mulf %10, %9 : vector<16x128xf32>
    %c0_4 = arith.constant 0 : index
    %c0_5 = arith.constant 0 : index
    %12 = vector.load %arg2[%c0_4, %c0_5] : memref<16x128xf32, #tpu.memory_space<vmem>>, vector<16x128xf32>
    tpu.vector_store %arg2[%c0_4, %c0_5], %11 {strides = array<i32>} : memref<16x128xf32, #tpu.memory_space<vmem>>, vector<16x128xf32>,
    return
  }
  func.func @transform_0(%arg0: i32) -> (i32, i32) {
    %c0_i32 = arith.constant 0 : i32
    %c0_i32_0 = arith.constant 0 : i32
    return %arg0, %c0_i32 : i32, i32
  }
  func.func @transform_1(%arg0: i32) -> (i32, i32) {
    %c0_i32 = arith.constant 0 : i32
    %c0_i32_0 = arith.constant 0 : i32
    return %arg0, %c0_i32 : i32, i32
  }
}

</mosaic_0001>

<bundles_post_ra>
// kernel: tpu_custom_call.1
= control target key start
LH: loop header
LB: loop body
LE: loop exit
PB: predicated region body
PF: predicated region fallthrough
CT: control target
= control target key end

     0   :  { %6 = vsyncpa [#allocation3], 0  ;;  %s154_s0 = inlined_call_operand.hbm [shape: f32[16,128], index: 0, kind: input, shape index: {}]   ;;  %s155_s1 = inlined_call_operand.hbm [shape: f32[16,128], index: 1, kind: output, shape index: {}]  }
   0x1   :  { %7 = vsyncpa [#allocation4], 0  ;;  %s12_s8 = sshll.u32 %s154_s0, 4  ;;  %s128_s9 = smov [#allocation2]   ;;  %s13_s8 = int_to_ptr.hbm [resolvable:$true] %s12_s8 }
   0x2   :  { %s14_s10 = sshll.u32 %s128_s9, 4  ;;  %s129_s11 = smov 128   ;;  %s15_s10 = int_to_ptr.vmem [resolvable:$true] %s14_s10 }
   0x3   :  { %s130_s12 = smov 8  }
   0x4   :  { %20 = dma.hbm_to_vmem [thread:$0]  %s13_s8, 256, %s15_s10, [#allocation3], %s129_s11, %s129_s11, %s130_s12  }
   0x5   :  { %124 = dma.done.wait [#allocation3], 256  }
   0x6   :  { %125 = vsyncadd [#allocation3], 4294967040  ;;  %v25_v0 = vld [vmem:[#allocation2] sm:$0xff]  ;;  %v26_v1 = vld [vmem:[#allocation2 + $0x8] sm:$0xff]  ;;  %s131_s0 = smov [#allocation5]   ;;  %s49_s16 = sshll.u32 %s155_s1, 4  ;;  %s50_s16 = int_to_ptr.hbm [resolvable:$true] %s49_s16 }
   0x7   :  { %v27_v2 = vmul.f32 4.0, %v25_v0  ;;  %v28_v3 = vmul.f32 4.0, %v26_v1  ;;  %s47_s13 = sshll.u32 %s131_s0, 4  ;;  %s48_s13 = int_to_ptr.vmem [resolvable:$true] %s47_s13 }
   0x9   :  { %v62_v4 = vadd.f32 -2.0, %v27_v2  ;;  %v33_v5 = vadd.f32 2.0, %v27_v2  ;;  %v63_v6 = vadd.f32 -2.0, %v28_v3  ;;  %v34_v7 = vadd.f32 2.0, %v28_v3 }
   0xb   :  { %68 = vtanh.f32 %v62_v4 }
   0xc   :  { %70 = vtanh.f32 %v33_v5 }
   0xd   :  { %72 = vtanh.f32 %v63_v6 }
   0xe   :  { %74 = vtanh.f32 %v34_v7 }
  0x11   :  { %v69_v8 = vpop.eup %68 }
  0x12   :  { %v71_v9 = vpop.eup %70 }
  0x13   :  { %v73_v10 = vpop.eup %72  ;;  %v37_v11 = vadd.f32 %v71_v9, %v69_v8 }
  0x14   :  { %v75_v12 = vpop.eup %74 }
  0x15   :  { %v39_v13 = vmul.f32 0.5, %v37_v11  ;;  %v38_v14 = vadd.f32 %v75_v12, %v73_v10 }
  0x17   :  { %41 = vst [vmem:[#allocation5] sm:$0xff] %v39_v13  ;;  %v40_v15 = vmul.f32 0.5, %v38_v14 }
  0x19   :  { %42 = vst [vmem:[#allocation5 + $0x8] sm:$0xff] %v40_v15 }
  0x1a   :  { %55 = dma.vmem_to_hbm [thread:$0]  %s48_s13, 256, %s50_s16, [#allocation4], %s129_s11, %s129_s11, %s130_s12  }
  0x1b   :  { %126 = dma.done.wait [#allocation4], 256  }
  0x1c   :  { %127 = vsyncadd [#allocation4], 4294967040 }
  0x1d   :  { %60 = vsyncpa [#allocation3], 1 }
  0x1e   :  { %61 = vsyncpa [#allocation4], 1 }

</bundles_post_ra>
